<compile_context>
chip_gen: v7x
topology: tpu7x:2x2x1
jax: 0.10.0
libtpu: 0.0.40
codegen_flags: <defaults>
</compile_context>

<pallas_src>
from functools import reduce, partial
from operator import mul

import numpy as np
import jax
import jax.numpy as jnp
from jax.experimental import pallas as pl
from jax.experimental.pallas import tpu as pltpu


# ---------------------------------------------------------------------------
# Deterministic re-implementation of get_connections_index (init-time, numpy).
# Mirrors the torch helpers (flatten<->multi index, clamp, round).
# ---------------------------------------------------------------------------
def get_connections_index(key, input_shape, neurons, focus, intensity=1):
    ndim = len(input_shape)
    flatten_len = reduce(mul, input_shape)
    k1, k2 = jax.random.split(key)

    centers_flatten = np.asarray(
        jax.random.randint(k1, (neurons,), 0, flatten_len), dtype=np.float64
    )

    # refers_base (row-major strides)
    refers = [1]
    rev = list(reversed(input_shape))
    for i in range(ndim - 1):
        refers.insert(0, rev[i] * refers[0])
    refers = np.asarray(refers, dtype=np.float64)

    # flatten index -> multi index
    cf = centers_flatten.copy()
    coords = []
    for r in refers:
        c = np.floor(cf / r)
        coords.append(c)
        cf = cf - c * r
    centers_multi = np.stack(coords, axis=1)               # (neurons, ndim)

    centers_sorted = np.sort(centers_multi, axis=0)         # column-wise sort
    centers_rep = np.tile(centers_sorted, (1, focus))       # (neurons, focus*ndim)

    sigma = np.sqrt(float(focus)) / 2.0
    rand = np.asarray(jax.random.normal(k2, centers_rep.shape), dtype=np.float64)
    conn = centers_rep + intensity * sigma * rand
    conn = conn.reshape(neurons, focus, ndim)

    max_vals = np.asarray(input_shape, dtype=np.float64) - 1.0
    conn = np.clip(conn, 0.0, max_vals)
    conn = np.round(conn)
    conn = conn.reshape(neurons * focus, ndim)

    flat = np.zeros(neurons * focus, dtype=np.float64)
    for i in range(ndim):
        flat = flat + conn[:, i] * refers[i]
    return flat.reshape(neurons, focus).astype(np.int32)    # (neurons, focus)


# ---------------------------------------------------------------------------
# Init-time folding: gather + weight multiply + focus-sum  ->  one TRANSPOSED,
# lane-dense matrix W_t of shape (neurons, flatten_len).  No padding needed at
# these sizes (32 % 8 == 0, 1024 % 128 == 0).
# ---------------------------------------------------------------------------
def build_combined_matrix_t(conn_idx, weights, bias, flatten_len):
    neurons, focus = conn_idx.shape

    w_t = np.zeros((neurons, flatten_len), dtype=np.float32)
    rows = np.repeat(np.arange(neurons, dtype=np.int64), focus)     # neuron id
    cols = np.asarray(conn_idx, dtype=np.int64).reshape(-1)         # flattened input index
    # scatter-ADD so duplicate indices within a neuron's focus set accumulate correctly
    np.add.at(w_t, (rows, cols), np.asarray(weights, dtype=np.float32).reshape(-1))

    bias_2d = np.asarray(bias, dtype=np.float32).reshape(1, neurons)
    return jnp.asarray(w_t), jnp.asarray(bias_2d)


# ---------------------------------------------------------------------------
# Pallas kernel: single NT matmul + bias.
#   x_ref:  (batch, flatten_len)    f32
#   wt_ref: (neurons, flatten_len)  f32   (combined gather*weights*group matrix, transposed)
#   b_ref:  (1, neurons)            f32
#   o_ref:  (batch, neurons)        f32
# ---------------------------------------------------------------------------
def limited_attention_kernel(x_ref, wt_ref, b_ref, o_ref):
    y = jax.lax.dot_general(
        x_ref[...], wt_ref[...],
        dimension_numbers=(((1,), (1,)), ((), ())),
        preferred_element_type=jnp.float32,
    )
    o_ref[...] = y + b_ref[...]


@partial(jax.jit, static_argnames=("output_shape",))
def limited_attention(x, w_t, bias_2d, output_shape):
    batch = x.shape[0]
    neurons, flatten_len = w_t.shape

    x_flat = x.reshape(batch, flatten_len)

    vmem = pl.BlockSpec(memory_space=pltpu.MemorySpace.VMEM)
    cost = pl.CostEstimate(
        flops=2 * batch * neurons * flatten_len,
        transcendentals=0,
        bytes_accessed=4 * (batch * flatten_len + neurons * flatten_len
                            + neurons + batch * neurons),
    )

    y = pl.pallas_call(
        limited_attention_kernel,
        out_shape=jax.ShapeDtypeStruct((batch, neurons), jnp.float32),
        in_specs=[vmem, vmem, vmem],
        out_specs=vmem,
        cost_estimate=cost,
    )(x_flat, w_t, bias_2d)

    return y.reshape(batch, *output_shape)


if __name__ == "__main__":
    # Small shapes consistent with the module's forward
    input_shape = (4, 16, 16)     # (C, H, W)
    output_shape = (4, 8)
    focus = 8
    intensity = 1
    batch = 2

    flatten_len = reduce(mul, input_shape)        # 1024
    neurons = reduce(mul, output_shape)           # 32

    key = jax.random.PRNGKey(0)
    k_idx, k_w, k_b, k_x = jax.random.split(key, 4)

    # Buffers / parameters (deterministic, mirrors __init__)
    conn_idx = get_connections_index(k_idx, input_shape, neurons, focus, intensity)
    weights = 0.01 * jax.random.normal(k_w, (neurons, focus), dtype=jnp.float32)
    bias = 0.01 * jax.random.normal(k_b, (neurons,), dtype=jnp.float32)

    # Fold gather + weight multiply + focus-sum into one transposed, lane-dense matrix at init.
    w_t, bias_2d = build_combined_matrix_t(conn_idx, weights, bias, flatten_len)

    # Example input
    x = jax.random.normal(k_x, (batch, *input_shape), dtype=jnp.float32)

    # Run kernel (jitted wrapper -> single dispatch)
    y = limited_attention(x, w_t, bias_2d, output_shape)
    y = jax.block_until_ready(y)

    # Pure-JAX reference (direct gather semantics, same as the torch forward)
    idx_flat = conn_idx.reshape(-1)
    x_flat = x.reshape(batch, -1)
    x_sel = jnp.take(x_flat, jnp.asarray(idx_flat), axis=1).reshape(batch, neurons, focus)
    ref = (x_sel * weights[None, :, :]).sum(-1) + bias
    ref = ref.reshape(batch, *output_shape)

    assert y.shape == (batch, *output_shape)
    np.testing.assert_allclose(np.asarray(y), np.asarray(ref), rtol=1e-5, atol=1e-5)
    print("KERNEL_OK")
</pallas_src>

<mosaic_0001>
module attributes {stable_mosaic.version = 11 : i64} {
  func.func @limited_attention_kernel(%arg0: memref<2x1024xf32, #tpu.memory_space<vmem>>, %arg1: memref<32x1024xf32, #tpu.memory_space<vmem>>, %arg2: memref<1x32xf32, #tpu.memory_space<vmem>>, %arg3: memref<2x32xf32, #tpu.memory_space<vmem>>) attributes {dimension_semantics = [], scalar_prefetch = 0 : i64, scratch_operands = 0 : i64, tpu.core_type = #tpu.core_type<tc>} {
    %c0 = arith.constant 0 : index
    %c0_0 = arith.constant 0 : index
    %0 = vector.load %arg0[%c0, %c0_0] : memref<2x1024xf32, #tpu.memory_space<vmem>>, vector<2x1024xf32>
    %c0_1 = arith.constant 0 : index
    %c0_2 = arith.constant 0 : index
    %1 = vector.load %arg1[%c0_1, %c0_2] : memref<32x1024xf32, #tpu.memory_space<vmem>>, vector<32x1024xf32>
    %cst = arith.constant dense<0.000000e+00> : vector<2x32xf32>
    %2 = tpu.matmul %0, %1, %cst {dimension_numbers = #tpu.dot_dimension_numbers<[1], [1], [0], [0], [0, 0, 1, 0], [], []>} : vector<2x1024xf32>, vector<32x1024xf32>, vector<2x32xf32> -> vector<2x32xf32>
    %c0_3 = arith.constant 0 : index
    %c0_4 = arith.constant 0 : index
    %3 = vector.load %arg2[%c0_3, %c0_4] : memref<1x32xf32, #tpu.memory_space<vmem>>, vector<1x32xf32>
    %4 = vector.broadcast %3 : vector<1x32xf32> to vector<2x32xf32>
    %5 = arith.addf %2, %4 : vector<2x32xf32>
    %c0_5 = arith.constant 0 : index
    %c0_6 = arith.constant 0 : index
    %6 = vector.load %arg3[%c0_5, %c0_6] : memref<2x32xf32, #tpu.memory_space<vmem>>, vector<2x32xf32>
    tpu.vector_store %arg3[%c0_5, %c0_6], %5 {strides = array<i32>} : memref<2x32xf32, #tpu.memory_space<vmem>>, vector<2x32xf32>,
    return
  }
}

</mosaic_0001>

<bundles_post_ra>
// kernel: limited_attention.1
= control target key start
LH: loop header
LB: loop body
LE: loop exit
PB: predicated region body
PF: predicated region fallthrough
CT: control target
= control target key end

     0   :  { %8 = vsyncpa [#allocation3], 0  ;;  %s469_s12 = smov [#allocation2]   ;;  %s517_s0 = inlined_call_operand.vmem [shape: f32[2,1024], index: 0, kind: input, shape index: {}]   ;;  %s518_s1 = inlined_call_operand.hbm [shape: f32[32,1024], index: 1, kind: input, shape index: {}]   ;;  %s519_s2 = inlined_call_operand.vmem [shape: f32[1,32], index: 2, kind: input, shape index: {}]   ;;  %s520_s3 = inlined_call_operand.vmem [shape: f32[2,32], index: 3, kind: output, shape index: {}]  }
   0x1   :  { %s16_s13 = sshll.u32 %s469_s12, 4  ;;  %s445_s16 = scalar_lea.hbm %s518_s1, 4096  ;;  %s17_s13 = int_to_ptr.vmem [resolvable:$true] %s16_s13 }
   0x2   :  { %p446_p0 = scmp.ne.s32.totalorder %s518_s1, %s445_s16  ;;  %p449_p1 = scmp.lt.u32.totalorder %s445_s16, %s518_s1 }
   0x4   :  { %p451_p2 = pnand %p449_p1, %p446_p0 }
   0x6   :  { %454 = shalt.err (!%p451_p2)
}
   0x7   :  { %s455_s21 = scalar_lea.vmem %s17_s13, 4096  ;;  %p460_p4 = scmp.lt.s32.totalorder %s17_s13, %s17_s13 }
   0x8   :  { %p456_p3 = scmp.ne.s32.totalorder %s17_s13, %s455_s21  ;;  %p461_p5 = scmp.lt.s32.totalorder %s455_s21, %s455_s21 }
   0xa   :  { %p462_p6 = por %p461_p5, %p460_p4 }
   0xc   :  { %p463_p7 = pnand %p462_p6, %p456_p3 }
   0xe   :  { %466 = shalt.err (!%p463_p7)
}
   0xf   :  { %s470_s22 = smov 1024   ;;  %s471_s23 = smov 64  }
  0x10   :  { %22 = dma.hbm_to_vmem [thread:$0]  %s518_s1, 4096, %s17_s13, [#allocation3], %s470_s22, %s470_s22, %s471_s23  }
  0x11   :  { %467 = dma.done.wait [#allocation3], 4096  }
  0x12   :  { %468 = vsyncadd [#allocation3], 4294963200  ;;  %v472_v0 = vmov 1983009808   ;;  %v75_v2 = vlaneseq  ;;  %v31_v5 = vld [vmem:[#allocation2 + $0x8] sm:$0xff]  ;;  %v30_v10 = vld [vmem:[#allocation2] sm:$0xff] }
  0x13   :  { %v73_v1 = vunpack.c.l.s4 %v472_v0  ;;  %v39_v6 = vld [vmem:[#allocation2 + $0x48] sm:$0xff]  ;;  %v38_v11 = vld [vmem:[#allocation2 + $0x40] sm:$0xff]  ;;  %v33_v30 = vld [vmem:[#allocation2 + $0x18] sm:$0xff]  ;;  %vm393_vm0 = vcmask 254976  }
  0x14   :  { %v76_v4 = vshrl.u32 %v75_v2, 7  ;;  %v35_v7 = vld [vmem:[#allocation2 + $0x28] sm:$0xff]  ;;  %v401_v8 = vpack.c.bf16 %v39_v6, %v31_v5  ;;  %v403_v13 = vpack.c.bf16 %v38_v11, %v30_v10  ;;  %v34_v14 = vld [vmem:[#allocation2 + $0x20] sm:$0xff]  ;;  %v41_v31 = vld [vmem:[#allocation2 + $0x58] sm:$0xff] }
  0x15   :  { %v74_v3 = vunpack.c.0.s8 %v73_v1  ;;  %v43_v9 = vld [vmem:[#allocation2 + $0x68] sm:$0xff]  ;;  %v42_v15 = vld [vmem:[#allocation2 + $0x60] sm:$0xff]  ;;  %v37_v34 = vld [vmem:[#allocation2 + $0x38] sm:$0xff]  ;;  %v409_v39 = vpack.c.bf16 %v41_v31, %v33_v30 }
  0x16   :  { %v417_v12 = vpack.c.bf16 %v43_v9, %v35_v7  ;;  %v47_v16 = vld [vmem:[#allocation2 + $0x88] sm:$0xff]  ;;  %402 = vmatprep.subr.bf16.mxu1 %v401_v8  ;;  %v419_v18 = vpack.c.bf16 %v42_v15, %v34_v14  ;;  %v46_v24 = vld [vmem:[#allocation2 + $0x80] sm:$0xff]  ;;  %v45_v35 = vld [vmem:[#allocation2 + $0x78] sm:$0xff] }
  0x17   :  { %v77_v17 = vsub.s32 %v74_v3, %v76_v4  ;;  %v55_v19 = vld [vmem:[#allocation2 + $0xc8] sm:$0xff]  ;;  %404 = vmatpush1.bf16.xpose.msra.mxu1 %v403_v13  ;;  %v54_v25 = vld [vmem:[#allocation2 + $0xc0] sm:$0xff]  ;;  %v425_v42 = vpack.c.bf16 %v45_v35, %v37_v34  ;;  %v32_v44 = vld [vmem:[#allocation2 + $0x10] sm:$0xff] }
  0x18   :  { %v51_v20 = vld [vmem:[#allocation2 + $0xa8] sm:$0xff]  ;;  %418 = vmatprep.subr.bf16.mxu0 %v417_v12  ;;  %v405_v22 = vpack.c.bf16 %v55_v19, %v47_v16  ;;  %v50_v26 = vld [vmem:[#allocation2 + $0xa0] sm:$0xff]  ;;  %v407_v36 = vpack.c.bf16 %v54_v25, %v46_v24  ;;  %v40_v45 = vld [vmem:[#allocation2 + $0x50] sm:$0xff] }
  0x19   :  { %v59_v21 = vld [vmem:[#allocation2 + $0xe8] sm:$0xff]  ;;  %420 = vmatpush1.bf16.xpose.msra.mxu0 %v419_v18  ;;  %v58_v27 = vld [vmem:[#allocation2 + $0xe0] sm:$0xff]  ;;  %v36_v46 = vld [vmem:[#allocation2 + $0x30] sm:$0xff]  ;;  %v411_v54 = vpack.c.bf16 %v40_v45, %v32_v44 }
  0x1a   :  { %v421_v23 = vpack.c.bf16 %v59_v21, %v51_v20  ;;  %v28_v28 = vld [vmem:[%s517_s0] sm:$0xff]  ;;  %406 = vmatprep.subr.bf16.mxu1 %v405_v22  ;;  %v29_v32 = vld [vmem:[%s517_s0 + $0x8] sm:$0xff]  ;;  %v423_v38 = vpack.c.bf16 %v58_v27, %v50_v26  ;;  %v44_v47 = vld [vmem:[#allocation2 + $0x70] sm:$0xff] }
  0x1b   :  { %v78_v29 = vrot.slane %v28_v28, %v77_v17  ;;  %v95_v33 = vrot.slane %v29_v32, %v77_v17  ;;  %v71_v41 = vcombine.high %v28_v28, %v28_v28  ;;  %v88_v43 = vcombine.high %v29_v32, %v29_v32  ;;  %v49_v48 = vld [vmem:[#allocation2 + $0x98] sm:$0xff]  ;;  %v48_v60 = vld [vmem:[#allocation2 + $0x90] sm:$0xff]  ;;  %v400_v2 = vld [vmem:[%s519_s2] ss:$0 sm:$0xff] }
  0x1c   :  { %422 = vmatprep.subr.bf16.mxu0 %v421_v23  ;;  %v57_v49 = vld [vmem:[#allocation2 + $0xd8] sm:$0xff]  ;;  %v427_v55 = vpack.c.bf16 %v44_v47, %v36_v46  ;;  %v56_v61 = vld [vmem:[#allocation2 + $0xd0] sm:$0xff] }
  0x1d   :  { %v86_v37 = vcombine.high %v78_v29, %v78_v29  ;;  %v103_v40 = vcombine.high %v95_v33, %v95_v33  ;;  %v85_v50 = vrot.slane %v71_v41, %v77_v17  ;;  %v53_v51 = vld [vmem:[#allocation2 + $0xb8] sm:$0xff]  ;;  %v102_v53 = vrot.slane %v88_v43, %v77_v17  ;;  %v52_v62 = vld [vmem:[#allocation2 + $0xb0] sm:$0xff] }
  0x1e   :  { %v61_v52 = vld [vmem:[#allocation2 + $0xf8] sm:$0xff]  ;;  %v413_v56 = vpack.c.bf16 %v57_v49, %v49_v48  ;;  %v60_v63 = vld [vmem:[#allocation2 + $0xf0] sm:$0xff]  ;;  %v415_v0 = vpack.c.bf16 %v56_v61, %v48_v60 }
  0x1f   :  { %177 = vmatprep.mubr.f32.mxu1 %v86_v37  ;;  %317 = vmatprep.mubr.f32.mxu0 %v103_v40  ;;  %v429_v57 = vpack.c.bf16 %v61_v52, %v53_v51  ;;  %v87_v58 = vcombine.high %v85_v50, %v85_v50  ;;  %v104_v59 = vcombine.high %v102_v53, %v102_v53 }
  0x20   :  { %408 = vmatpush1.bf16.xpose.msra.mxu1 %v407_v36  ;;  %v431_v1 = vpack.c.bf16 %v60_v63, %v52_v62 }
  0x21   :  { %424 = vmatpush1.bf16.xpose.msra.mxu0 %v423_v38  ;;  %410 = vmatprep.subr.bf16.mxu1 %v409_v39 }
  0x22   :  { %426 = vmatprep.subr.bf16.mxu0 %v425_v42 }
  0x27   :  { %178 = vmatmul.mubr.f32.vlgmr.msra.gmra.mrb[0].mxu1 %v78_v29 }
  0x28   :  { %412 = vmatpush1.bf16.xpose.msra.mxu1 %v411_v54  ;;  %318 = vmatmul.mubr.f32.vlgmr.msra.gmra.mrb[0].mxu0 %v95_v33 }
  0x29   :  { %428 = vmatpush1.bf16.xpose.msra.mxu0 %v427_v55  ;;  %414 = vmatprep.subr.bf16.mxu1 %v413_v56 }
  0x2a   :  { %430 = vmatprep.subr.bf16.mxu0 %v429_v57  ;;  %247 = vmatprep.mubr.f32.mxu1 %v87_v58 }
  0x2b   :  { %387 = vmatprep.mubr.f32.mxu0 %v104_v59 }
  0x30   :  { %416 = vmatpush1.bf16.xpose.msra.mxu1 %v415_v0 }
  0x31   :  { %432 = vmatpush1.bf16.xpose.msra.mxu0 %v431_v1 }
  0x37   :  { %248 = vmatmul.mubr.f32.vlgmr.msra.gmra.mrb[0].mxu1 %v85_v50 }
  0x38   :  { %388 = vmatmul.mubr.f32.vlgmr.msra.gmra.mrb[0].mxu0 %v102_v53 }
 0x10a   :  { %v249_v3 = vpop.f32.mrb[0].mxu1 }
 0x10b   :  { %v433_v4 = vadd.f32 %v400_v2, %v249_v3  ;;  %v389_v5 = vpop.f32.mrb[0].mxu0  ;;  %v251_v6 = vpop.f32.mrb[1].mxu1 }
 0x10c   :  { %v391_v7 = vpop.f32.mrb[1].mxu0 }
 0x10d   :  { %v434_v8 = vadd.f32 %v433_v4, %v389_v5 }
 0x10f   :  { %394 = vst.msk [vmem:[%s520_s3] sm:$0x3] %vm393_vm0, %v434_v8 }
 0x110   :  { %399 = vsyncpa [#allocation3], 1 }

</bundles_post_ra>
